<compile_context>
chip_gen: v6e
topology: v6e:2x2x1
jax: 0.10.0
libtpu: 0.0.40
codegen_flags: <defaults>
</compile_context>

<pallas_src>
import jax
import jax.numpy as jnp
from jax.experimental import pallas as pl
from jax.experimental.pallas import tpu as pltpu

MARGIN = 2.0
EPS = 1e-6  # F.pairwise_distance default eps (added to the elementwise difference)


def _round_up(x, m):
    return ((x + m - 1) // m) * m


def _cdiv(a, b):
    return -(-a // b)


def _vmem_limit_bytes():
    """Scoped-VMEM limit to request, derived from the chip's physical VMEM."""
    try:
        phys = int(pltpu.get_tpu_info().vmem_capacity_bytes)
    except Exception:
        phys = 64 * 1024 * 1024  # conservative fallback (v7x physical size)
    # Half of physical, capped at 64 MiB: -> 64 MiB on v5e/v6e (128 MiB physical),
    # 32 MiB on v7x (64 MiB physical).
    return min(phys // 2, 64 * 1024 * 1024)


def _pick_block_rows(B, D, itemsize, vmem_limit):
    """Largest batch tile that fits the VMEM budget, with a >=4-tile floor."""
    d_lane = _round_up(D, 128)
    # Resident bytes per tile row: 2 inputs x 2 pipeline buffers (lane-padded)
    # + the (TB,1) label block, which is laid out lane-padded to 128 (x2 buffers).
    per_row = 2 * 2 * d_lane * itemsize + 2 * 128 * 4
    budget = int(0.7 * vmem_limit)  # headroom for outputs + Mosaic internal scratch
    tb = max(8, min(4096, (budget // per_row) // 8 * 8))
    # Keep at least ~4 grid steps when B allows, so the "parallel" grid axis can
    # feed both TensorCores on v7x and the pipeline has something to overlap.
    tb = min(tb, _round_up(_cdiv(B, 4), 8))
    return max(8, tb)


def _row_sum_sq(sq):
    """Row-wise sum over the feature axis, minimizing XLU work.

    VPU-adds full 128-lane groups into a single (rows, 128) slab, then does one
    cross-lane reduce (+ one narrow reduce for a ragged tail).
    """
    d = sq.shape[-1]
    groups = d // 128
    if groups >= 2:
        acc = sq[:, 0:128]
        for g in range(1, groups):
            acc = acc + sq[:, g * 128:(g + 1) * 128]
        total = jnp.sum(acc, axis=-1, keepdims=True)
        if d % 128:
            total = total + jnp.sum(sq[:, groups * 128:], axis=-1, keepdims=True)
        return total
    return jnp.sum(sq, axis=-1, keepdims=True)


def contrastive_loss(output1, output2, label, margin=MARGIN, block_rows=None):
    """output1, output2: (B, D) float (f32 or bf16); label: (B,) -> scalar f32 loss."""
    B, D = output1.shape
    itemsize = jnp.dtype(output1.dtype).itemsize
    vmem_limit = _vmem_limit_bytes()

    if block_rows is None:
        TB = _pick_block_rows(B, D, itemsize, vmem_limit)
    else:
        TB = max(8, min(4096, (int(block_rows) // 8) * 8))
    num_tiles = _cdiv(B, TB)

    lab = label.reshape(B, 1).astype(jnp.float32)
    margin_f = float(margin)

    def kernel(o1_ref, o2_ref, lab_ref, out_ref):
        tile = pl.program_id(0)
        # Inputs may be bf16 in HBM (halves memory traffic); compute in f32.
        diff = o1_ref[...].astype(jnp.float32) - o2_ref[...].astype(jnp.float32) + EPS
        d2 = _row_sum_sq(diff * diff)                 # (TB, 1) squared distance
        d = jnp.sqrt(d2)                              # EUP sqrt (hinge term only)
        hinge = jnp.maximum(margin_f - d, 0.0)
        lab_t = lab_ref[...]                          # (TB, 1) f32
        per_row = (1.0 - lab_t) * d2 + lab_t * (hinge * hinge)

        # Unconditional select-based row mask: the out-of-bounds tail of the
        # ragged last tile is uninitialized VMEM (may hold NaN/Inf); jnp.where
        # keeps it out of the partial sum, and the wrapper divides by the true B.
        row = jax.lax.broadcasted_iota(jnp.int32, (TB, 1), 0) + tile * TB
        per_row = jnp.where(row < B, per_row, 0.0)

        partial = jnp.sum(per_row, keepdims=True)     # (1, 1)
        # Lane-dense, unmasked store of the per-tile partial sum.
        out_ref[...] = jnp.broadcast_to(partial.reshape(1, 1, 1), (1, 8, 128))

    partials = pl.pallas_call(
        kernel,
        out_shape=jax.ShapeDtypeStruct((num_tiles, 8, 128), jnp.float32),
        grid=(num_tiles,),
        in_specs=[
            # Full feature dim as the block width: no padding, no column mask.
            pl.BlockSpec((TB, D), lambda i: (i, 0)),
            pl.BlockSpec((TB, D), lambda i: (i, 0)),
            pl.BlockSpec((TB, 1), lambda i: (i, 0)),
        ],
        out_specs=pl.BlockSpec((1, 8, 128), lambda i: (i, 0, 0)),
        compiler_params=pltpu.CompilerParams(
            # Tiles are independent (no shared accumulator) -> megacore-friendly.
            dimension_semantics=("parallel",),
            vmem_limit_bytes=int(vmem_limit),
        ),
    )(output1, output2, lab)

    # Final reduction + true-batch mean in the wrapper (cheap: num_tiles values).
    return jnp.sum(partials[:, 0, 0]) / B


def contrastive_loss_ref(output1, output2, label, margin=MARGIN):
    """Pure-JAX reference mirroring torch.nn.functional.pairwise_distance + loss."""
    diff = output1.astype(jnp.float32) - output2.astype(jnp.float32) + EPS
    d = jnp.sqrt(jnp.sum(diff * diff, axis=-1))
    per = (1.0 - label) * d**2 + label * jnp.maximum(margin - d, 0.0) ** 2
    return jnp.mean(per)


if __name__ == "__main__":
    key = jax.random.PRNGKey(0)
    k1, k2, k3, k4, k5, k6, k7, k8, k9 = jax.random.split(key, 9)

    # Case 1: tiny embedding pair batch (toy siamese setup); D not a multiple of 128.
    B1, D1 = 8, 32
    o1 = jax.random.normal(k1, (B1, D1), dtype=jnp.float32)
    o2 = jax.random.normal(k2, (B1, D1), dtype=jnp.float32)
    lab1 = jax.random.bernoulli(k3, 0.5, (B1,)).astype(jnp.float32)  # 0=similar, 1=dissimilar
    loss1 = jax.block_until_ready(contrastive_loss(o1, o2, lab1))
    ref1 = contrastive_loss_ref(o1, o2, lab1)
    assert jnp.allclose(loss1, ref1, rtol=1e-5, atol=1e-5), (loss1, ref1)

    # Case 2: ragged batch tiles (300 % 64 != 0) and a multi-lane-group reduce
    # with a ragged feature tail (333 = 2*128 + 77).
    B2, D2 = 300, 333
    o1b = jax.random.normal(k4, (B2, D2), dtype=jnp.float32)
    o2b = jax.random.normal(k5, (B2, D2), dtype=jnp.float32)
    lab2 = jax.random.bernoulli(k6, 0.5, (B2,)).astype(jnp.float32)
    loss2 = jax.block_until_ready(contrastive_loss(o1b, o2b, lab2, block_rows=64))
    ref2 = contrastive_loss_ref(o1b, o2b, lab2)
    assert jnp.allclose(loss2, ref2, rtol=1e-5, atol=1e-5), (loss2, ref2)

    # Case 3: bf16 embeddings end-to-end (kernel upcasts to f32), auto tile sizing.
    B3, D3 = 64, 200
    o1c = jax.random.normal(k7, (B3, D3), dtype=jnp.bfloat16)
    o2c = jax.random.normal(k8, (B3, D3), dtype=jnp.bfloat16)
    lab3 = jax.random.bernoulli(k9, 0.5, (B3,)).astype(jnp.float32)
    loss3 = jax.block_until_ready(contrastive_loss(o1c, o2c, lab3))
    ref3 = contrastive_loss_ref(o1c, o2c, lab3)
    assert jnp.allclose(loss3, ref3, rtol=1e-4, atol=1e-4), (loss3, ref3)

    print("KERNEL_OK")
</pallas_src>

<mosaic_0001>
module attributes {stable_mosaic.version = 11 : i64} {
  func.func @kernel(%arg0: i32, %arg1: memref<8x32xf32, #tpu.memory_space<vmem>>, %arg2: memref<8x32xf32, #tpu.memory_space<vmem>>, %arg3: memref<8x1xf32, #tpu.memory_space<vmem>>, %arg4: memref<1x8x128xf32, #tpu.memory_space<vmem>>) attributes {dimension_semantics = [#tpu.dimension_semantics<parallel>], iteration_bounds = array<i64: 1>, scalar_prefetch = 0 : i64, scratch_operands = 0 : i64, tpu.core_type = #tpu.core_type<tc>, window_params = [{transform_indices = @transform_0, window_bounds = array<i64: 8, 32>}, {transform_indices = @transform_1, window_bounds = array<i64: 8, 32>}, {transform_indices = @transform_2, window_bounds = array<i64: 8, 1>}, {transform_indices = @transform_3, window_bounds = array<i64: 1, 8, 128>}]} {
    %c0 = arith.constant 0 : index
    %c0_0 = arith.constant 0 : index
    %0 = vector.load %arg1[%c0, %c0_0] : memref<8x32xf32, #tpu.memory_space<vmem>>, vector<8x32xf32>
    %c0_1 = arith.constant 0 : index
    %c0_2 = arith.constant 0 : index
    %1 = vector.load %arg2[%c0_1, %c0_2] : memref<8x32xf32, #tpu.memory_space<vmem>>, vector<8x32xf32>
    %2 = arith.subf %0, %1 : vector<8x32xf32>
    %cst = arith.constant 9.99999997E-7 : f32
    %3 = vector.broadcast %cst : f32 to vector<8x32xf32>
    %4 = arith.addf %2, %3 : vector<8x32xf32>
    %5 = arith.mulf %4, %4 : vector<8x32xf32>
    %cst_3 = arith.constant dense<0.000000e+00> : vector<8xf32>
    %6 = vector.multi_reduction <add>, %5, %cst_3 [1] : vector<8x32xf32> to vector<8xf32>
    %7 = vector.shape_cast %6 : vector<8xf32> to vector<8x1xf32>
    %8 = math.sqrt %7 : vector<8x1xf32>
    %cst_4 = arith.constant 2.000000e+00 : f32
    %9 = vector.broadcast %cst_4 : f32 to vector<8x1xf32>
    %10 = arith.subf %9, %8 : vector<8x1xf32>
    %cst_5 = arith.constant 0.000000e+00 : f32
    %11 = vector.broadcast %cst_5 : f32 to vector<8x1xf32>
    %12 = arith.maximumf %10, %11 : vector<8x1xf32>
    %c0_6 = arith.constant 0 : index
    %c0_7 = arith.constant 0 : index
    %13 = vector.load %arg3[%c0_6, %c0_7] : memref<8x1xf32, #tpu.memory_space<vmem>>, vector<8x1xf32>
    %cst_8 = arith.constant 1.000000e+00 : f32
    %14 = vector.broadcast %cst_8 : f32 to vector<8x1xf32>
    %15 = arith.subf %14, %13 : vector<8x1xf32>
    %16 = arith.mulf %15, %7 : vector<8x1xf32>
    %17 = arith.mulf %12, %12 : vector<8x1xf32>
    %18 = arith.mulf %13, %17 : vector<8x1xf32>
    %19 = arith.addf %16, %18 : vector<8x1xf32>
    %20 = tpu.iota {dimensions = array<i32: 0>} : vector<8x1xi32>
    %c8_i32 = arith.constant 8 : i32
    %21 = arith.muli %arg0, %c8_i32 : i32
    %22 = vector.broadcast %21 : i32 to vector<8x1xi32>
    %23 = arith.addi %20, %22 : vector<8x1xi32>
    %c8_i32_9 = arith.constant 8 : i32
    %24 = vector.broadcast %c8_i32_9 : i32 to vector<8x1xi32>
    %25 = arith.cmpi slt, %23, %24 : vector<8x1xi32>
    %cst_10 = arith.constant 0.000000e+00 : f32
    %26 = vector.broadcast %cst_10 : f32 to vector<8x1xf32>
    %27 = arith.select %25, %19, %26 : vector<8x1xi1>, vector<8x1xf32>
    %28 = vector.shape_cast %27 : vector<8x1xf32> to vector<1x8x1xf32>
    %cst_11 = arith.constant dense<0.000000e+00> : vector<1xf32>
    %29 = vector.multi_reduction <add>, %28, %cst_11 [1, 2] : vector<1x8x1xf32> to vector<1xf32>
    %30 = vector.shape_cast %29 : vector<1xf32> to vector<1x1x1xf32>
    %31 = vector.extract %30[0, 0, 0] : f32 from vector<1x1x1xf32>
    %32 = vector.broadcast %31 : f32 to vector<1x1xf32>
    %33 = vector.shape_cast %32 : vector<1x1xf32> to vector<1x1x1xf32>
    %34 = vector.shape_cast %33 : vector<1x1x1xf32> to vector<1x1x1xf32>
    %35 = vector.broadcast %34 : vector<1x1x1xf32> to vector<1x8x128xf32>
    %c0_12 = arith.constant 0 : index
    %c0_13 = arith.constant 0 : index
    %c0_14 = arith.constant 0 : index
    %36 = vector.load %arg4[%c0_12, %c0_13, %c0_14] : memref<1x8x128xf32, #tpu.memory_space<vmem>>, vector<1x8x128xf32>
    tpu.vector_store %arg4[%c0_12, %c0_13, %c0_14], %35 {strides = array<i32>} : memref<1x8x128xf32, #tpu.memory_space<vmem>>, vector<1x8x128xf32>,
    return
  }
  func.func @transform_0(%arg0: i32) -> (i32, i32) {
    %c0_i32 = arith.constant 0 : i32
    %c0_i32_0 = arith.constant 0 : i32
    return %arg0, %c0_i32 : i32, i32
  }
  func.func @transform_1(%arg0: i32) -> (i32, i32) {
    %c0_i32 = arith.constant 0 : i32
    %c0_i32_0 = arith.constant 0 : i32
    return %arg0, %c0_i32 : i32, i32
  }
  func.func @transform_2(%arg0: i32) -> (i32, i32) {
    %c0_i32 = arith.constant 0 : i32
    %c0_i32_0 = arith.constant 0 : i32
    return %arg0, %c0_i32 : i32, i32
  }
  func.func @transform_3(%arg0: i32) -> (i32, i32, i32) {
    %c0_i32 = arith.constant 0 : i32
    %c0_i32_0 = arith.constant 0 : i32
    %c0_i32_1 = arith.constant 0 : i32
    return %arg0, %c0_i32, %c0_i32_0 : i32, i32, i32
  }
}

</mosaic_0001>

<bundles_post_ra>
// kernel: tpu_custom_call.1
= control target key start
LH: loop header
LB: loop body
LE: loop exit
PB: predicated region body
PF: predicated region fallthrough
CT: control target
= control target key end

     0   :  { %8 = vsyncpa [#allocation3], 0  ;;  %s170_s0 = inlined_call_operand.vmem [shape: f32[8,32], index: 0, kind: input, shape index: {}]   ;;  %s171_s1 = inlined_call_operand.hbm [shape: f32[8,32], index: 1, kind: input, shape index: {}]   ;;  %s172_s2 = inlined_call_operand.vmem [shape: f32[8,1], index: 2, kind: input, shape index: {}]   ;;  %s173_s3 = inlined_call_operand.hbm [shape: f32[1,8,128], index: 3, kind: output, shape index: {}]  }
   0x1   :  { %9 = vsyncpa [#allocation4], 0  ;;  %s136_s12 = smov [#allocation2]  }
   0x2   :  { %s18_s13 = sshll.u32 %s136_s12, 4  ;;  %s19_s13 = int_to_ptr.vmem [resolvable:$true] %s18_s13 }
   0x3   :  { %s100_s14 = scalar_lea.vmem %s19_s13, 128  ;;  %p105_p1 = scmp.lt.s32.totalorder %s19_s13, %s19_s13 }
   0x4   :  { %p101_p0 = scmp.ne.s32.totalorder %s19_s13, %s100_s14  ;;  %p106_p2 = scmp.lt.s32.totalorder %s100_s14, %s100_s14 }
   0x6   :  { %p107_p3 = por %p106_p2, %p105_p1 }
   0x8   :  { %p108_p4 = pnand %p107_p3, %p101_p0 }
   0xa   :  { %111 = shalt.err (!%p108_p4)
}
   0xb   :  { %21 = dma.hbm_to_vmem [thread:$0]  %s171_s1, 128, %s19_s13, [#allocation3]  }
   0xc   :  { %132 = dma.done.wait [#allocation3], 128  }
   0xd   :  { %133 = vsyncadd [#allocation3], 4294967168  ;;  %v27_v0 = vld [vmem:[%s170_s0] sm:$0xff]  ;;  %vm32_vm0 = vcmask 261120   ;;  %vm58_vm3 = vcmask 7168   ;;  %s137_s0 = smov [#allocation5]  }
   0xe   :  { %v28_v1 = vld [vmem:[#allocation2] sm:$0xff] }
   0xf   :  { %v29_v2 = vsub.f32 %v27_v0, %v28_v1  ;;  %v45_v12 = vld [vmem:[%s172_s2] sm:$0xff]  ;;  %s77_s2 = sshll.u32 %s137_s0, 4  ;;  %s78_s2 = int_to_ptr.vmem [resolvable:$true] %s77_s2 }
  0x10   :  { %v46_v15 = vsub.f32 1.0, %v45_v12  ;;  %s112_s21 = scalar_lea.vmem %s78_s2, 128  ;;  %p117_p6 = scmp.lt.s32.totalorder %s78_s2, %s78_s2 }
  0x11   :  { %v30_v3 = vadd.f32 1e-06, %v29_v2  ;;  %p113_p5 = scmp.ne.s32.totalorder %s78_s2, %s112_s21  ;;  %p118_p7 = scmp.lt.s32.totalorder %s112_s21, %s112_s21 }
  0x13   :  { %v31_v4 = vmul.f32 %v30_v3, %v30_v3  ;;  %p119_p8 = por %p118_p7, %p117_p6 }
  0x15   :  { %v33_v5 = vsel %vm32_vm0, %v31_v4, 0.0  ;;  %p120_p9 = pnand %p119_p8, %p113_p5 }
  0x16   :  { %34 = vadd.xlane.f32.xlu0 %v33_v5 }
  0x9f   :  { %v35_v6 = vpop.xlane.xlu0 %34 }
  0xa0   :  { %90 = vrsqrt.f32 %v35_v6  ;;  %vm38_vm1 = vcmp.eq.f32.partialorder %v35_v6, inf  ;;  %v41_v9 = vand.u32 2147483648, %v35_v6  ;;  %vm40_vm2 = vcmp.eq.f32.partialorder %v35_v6, 0.0 }
  0xa1   :  { %v47_v17 = vmul.f32 %v46_v15, %v35_v6 }
  0xad   :  { %v91_v7 = vpop.eup %90 }
  0xae   :  { %v37_v8 = vmul.f32 %v91_v7, %v35_v6 }
  0xb0   :  { %v39_v10 = vsel %vm38_vm1, %v35_v6, %v37_v8 }
  0xb1   :  { %v42_v11 = vsel %vm40_vm2, %v41_v9, %v39_v10 }
  0xb2   :  { %v43_v13 = vsub.f32 2.0, %v42_v11 }
  0xb4   :  { %v44_v14 = vmax.f32 %v43_v13, 0.0 }
  0xb6   :  { %v48_v16 = vmul.f32 %v44_v14, %v44_v14 }
  0xb8   :  { %v49_v18 = vmul.f32 %v48_v16, %v45_v12 }
  0xba   :  { %v50_v19 = vadd.f32 %v49_v18, %v47_v17 }
  0xbc   :  { %v59_v20 = vsel %vm58_vm3, %v50_v19, 0.0 }
  0xbd   :  { %60 = vadd.xlane.f32.xlu0 %v59_v20 }
 0x146   :  { %v61_v21 = vpop.xlane.xlu0 %60 }
 0x147   :  { %v62_v22 = vrot.slane %v61_v21, 4 }
 0x149   :  { %v63_v23 = vadd.f32 %v62_v22, %v61_v21 }
 0x14b   :  { %v64_v24 = vrot.slane %v63_v23, 2 }
 0x14d   :  { %v65_v25 = vadd.f32 %v64_v24, %v63_v23 }
 0x14f   :  { %v66_v26 = vrot.slane %v65_v25, 1 }
 0x151   :  { %v67_v27 = vadd.f32 %v66_v26, %v65_v25 }
 0x153   :  { %86 = vpush %v67_v27 }
 0x184   :  { %s87_s20 = spop %86 }
 0x185   :  { %v69_v28 = vstv %s87_s20 }
 0x186   :  { %70 = vst [vmem:[#allocation5] sm:$0xff] %v69_v28 }
 0x187   :  { %123 = shalt.err (!%p120_p9)
}
 0x188   :  { %80 = dma.vmem_to_hbm [thread:$0]  %s78_s2, 128, %s173_s3, [#allocation4]  }
 0x189   :  { %134 = dma.done.wait [#allocation4], 128  }
 0x18a   :  { %135 = vsyncadd [#allocation4], 4294967168 }
 0x18b   :  { %84 = vsyncpa [#allocation3], 1 }
 0x18c   :  { %85 = vsyncpa [#allocation4], 1 }

</bundles_post_ra>
